<compile_context>
chip_gen: v7x
topology: tpu7x:2x2x1
jax: 0.10.0
libtpu: 0.0.40
codegen_flags: <defaults>
</compile_context>

<pallas_src>
import jax
import jax.numpy as jnp
from jax.experimental import pallas as pl
from jax.experimental.pallas import tpu as pltpu


def _round_up(x, m):
    return ((x + m - 1) // m) * m


def _f1focal_partial_kernel(pred_ref, targ_ref, out_ref):
    """Accumulates per-split partial stats into out_ref (shape (3, C_pad))."""
    i = pl.program_id(1)  # inner ("arbitrary") batch-block axis

    pred = pred_ref[...].astype(jnp.float32)   # (block_n, C_pad)
    targ = targ_ref[...].astype(jnp.float32)   # (block_n, C_pad)

    # ---- F1 partial stats ----
    # f1 = 2*tp / (2*tp + fp + tn) == 2*sum(pred*targ) / (sum(pred) + sum(targ))
    sum_pt  = jnp.sum(pred * targ, axis=0, keepdims=True)   # (1, C_pad)
    sum_den = jnp.sum(pred + targ, axis=0, keepdims=True)   # (1, C_pad)

    # ---- Focal partial (gamma=2, eps=1e-10) ----
    # x[targ==1] = pred ; x[targ==0] = 1 - pred ; else 0 (exact PyTorch
    # semantics, so non-binary targets behave identically to the reference).
    eps = jnp.float32(1e-10)
    x = jnp.where(targ == 1.0, pred,
                  jnp.where(targ == 0.0, 1.0 - pred, jnp.float32(0.0)))
    x = jnp.where(x < eps, x + eps, x)
    one_minus_x = 1.0 - x
    # Padded rows/classes: pred = targ = 0 -> x = 1 -> (1-x)^2 * log(x) = 0.
    focal_row = jnp.sum(one_minus_x * one_minus_x * jnp.log(x),
                        axis=0, keepdims=True)               # (1, C_pad)

    block = jnp.concatenate([sum_pt, sum_den, focal_row], axis=0)  # (3, C_pad)

    @pl.when(i == 0)
    def _():
        out_ref[...] = jnp.zeros_like(out_ref)

    out_ref[...] += block


def f1focal(pred, targ, *, block_n=2048, num_splits=2, l=0.1):
    """Pallas implementation of F1Focal.forward(pred, targ). pred/targ: (N, C)."""
    N, C = pred.shape
    assert targ.shape == (N, C)

    # Lane-dense class axis.
    C_pad = max(128, _round_up(C, 128))

    # Tile sizing: target ~4 MiB of combined (pred+targ) input bytes per step
    # (double-buffered -> ~8 MiB VMEM), and never exceed the (padded) batch.
    bytes_per_row = C_pad * (jnp.dtype(pred.dtype).itemsize +
                             jnp.dtype(targ.dtype).itemsize)
    target_rows = max(8, (4 * 1024 * 1024) // bytes_per_row)
    block_n = min(block_n, target_rows, _round_up(N, 8))
    block_n = max(8, (block_n // 8) * 8)

    # Batch padding so that N_pad = num_splits * nblk * block_n.
    nblk = pl.cdiv(pl.cdiv(N, block_n), num_splits)
    N_pad = num_splits * nblk * block_n

    pad_n, pad_c = N_pad - N, C_pad - C
    if pad_n or pad_c:
        pred = jnp.pad(pred, ((0, pad_n), (0, pad_c)))
        targ = jnp.pad(targ, ((0, pad_n), (0, pad_c)))

    stats = pl.pallas_call(
        _f1focal_partial_kernel,
        out_shape=jax.ShapeDtypeStruct((num_splits, 3, C_pad), jnp.float32),
        grid=(num_splits, nblk),
        in_specs=[
            pl.BlockSpec((block_n, C_pad), lambda p, i: (p * nblk + i, 0)),
            pl.BlockSpec((block_n, C_pad), lambda p, i: (p * nblk + i, 0)),
        ],
        out_specs=pl.BlockSpec((None, 3, C_pad), lambda p, i: (p, 0, 0)),
        compiler_params=pltpu.CompilerParams(
            dimension_semantics=("parallel", "arbitrary"),
            vmem_limit_bytes=32 * 1024 * 1024,
        ),
    )(pred, targ)

    # ---- Tiny O(C) finalize in plain JAX ----
    stats = jnp.sum(stats, axis=0)                 # combine the parallel splits
    tp  = stats[0, :C]
    den = stats[1, :C]                             # == 2*tp + fp + tn
    f1 = 2.0 * tp / den                            # may contain 0/0 -> nan
    finite = jnp.isfinite(f1)
    f1_mean = jnp.sum(jnp.where(finite, f1, 0.0)) / jnp.sum(finite.astype(jnp.float32))
    f1_loss = 1.0 - f1_mean

    focal = -(jnp.sum(stats[2]) / jnp.float32(N))  # true N, not padded rows

    return focal + jnp.float32(l) * f1_loss


def f1focal_ref(pred, targ):
    # Pure-JAX reference mirroring the PyTorch forward exactly.
    pred = pred.astype(jnp.float32)
    targ = targ.astype(jnp.float32)
    tp = (pred * targ).sum(axis=0)
    fp = (pred * (1.0 - targ)).sum(axis=0)
    tn = ((1.0 - pred) * targ).sum(axis=0)
    f1 = 2.0 * tp / (2.0 * tp + fp + tn)
    finite = jnp.isfinite(f1)
    f1_loss = 1.0 - jnp.sum(jnp.where(finite, f1, 0.0)) / jnp.sum(finite)
    eps = 1e-10
    x = jnp.where(targ == 1.0, pred, jnp.where(targ == 0.0, 1.0 - pred, 0.0))
    x = jnp.where(x < eps, x + eps, x)
    focal = -jnp.mean(jnp.sum(((1.0 - x) ** 2) * jnp.log(x), axis=1))
    return focal + 0.1 * f1_loss


if __name__ == "__main__":
    key = jax.random.PRNGKey(0)
    k1, k2 = jax.random.split(key)
    N, C = 64, 48  # (batch, classes) — small deterministic test shapes
    # pred: probabilities in (0,1); targ: binary labels {0,1}
    pred = jax.nn.sigmoid(jax.random.normal(k1, (N, C), dtype=jnp.float32))
    targ = (jax.random.uniform(k2, (N, C)) > 0.5).astype(jnp.float32)

    out = f1focal(pred, targ)
    jax.block_until_ready(out)

    ref = f1focal_ref(pred, targ)
    assert jnp.allclose(out, ref, rtol=1e-5, atol=1e-5), (out, ref)

    print("KERNEL_OK")
</pallas_src>

<mosaic_0001>
module attributes {stable_mosaic.version = 11 : i64} {
  func.func @_f1focal_partial_kernel(%arg0: i32, %arg1: i32, %arg2: memref<64x128xf32, #tpu.memory_space<vmem>>, %arg3: memref<64x128xf32, #tpu.memory_space<vmem>>, %arg4: memref<1x3x128xf32, #tpu.memory_space<vmem>>) attributes {dimension_semantics = [#tpu.dimension_semantics<parallel>, #tpu.dimension_semantics<arbitrary>], iteration_bounds = array<i64: 2, 1>, scalar_prefetch = 0 : i64, scratch_operands = 0 : i64, tpu.core_type = #tpu.core_type<tc>, window_params = [{transform_indices = @transform_0, window_bounds = array<i64: 64, 128>}, {transform_indices = @transform_1, window_bounds = array<i64: 64, 128>}, {transform_indices = @transform_2, window_bounds = array<i64: 1, 3, 128>}]} {
    %c0 = arith.constant 0 : index
    %c0_0 = arith.constant 0 : index
    %0 = vector.load %arg2[%c0, %c0_0] : memref<64x128xf32, #tpu.memory_space<vmem>>, vector<64x128xf32>
    %c0_1 = arith.constant 0 : index
    %c0_2 = arith.constant 0 : index
    %1 = vector.load %arg3[%c0_1, %c0_2] : memref<64x128xf32, #tpu.memory_space<vmem>>, vector<64x128xf32>
    %2 = arith.mulf %0, %1 : vector<64x128xf32>
    %cst = arith.constant dense<0.000000e+00> : vector<128xf32>
    %3 = vector.multi_reduction <add>, %2, %cst [0] : vector<64x128xf32> to vector<128xf32>
    %4 = vector.shape_cast %3 : vector<128xf32> to vector<1x128xf32>
    %5 = arith.addf %0, %1 : vector<64x128xf32>
    %cst_3 = arith.constant dense<0.000000e+00> : vector<128xf32>
    %6 = vector.multi_reduction <add>, %5, %cst_3 [0] : vector<64x128xf32> to vector<128xf32>
    %7 = vector.shape_cast %6 : vector<128xf32> to vector<1x128xf32>
    %cst_4 = arith.constant 1.000000e+00 : f32
    %8 = vector.broadcast %cst_4 : f32 to vector<64x128xf32>
    %9 = arith.cmpf oeq, %1, %8 : vector<64x128xf32>
    %cst_5 = arith.constant 0.000000e+00 : f32
    %10 = vector.broadcast %cst_5 : f32 to vector<64x128xf32>
    %11 = arith.cmpf oeq, %1, %10 : vector<64x128xf32>
    %cst_6 = arith.constant 1.000000e+00 : f32
    %12 = vector.broadcast %cst_6 : f32 to vector<64x128xf32>
    %13 = arith.subf %12, %0 : vector<64x128xf32>
    %cst_7 = arith.constant 0.000000e+00 : f32
    %14 = vector.broadcast %cst_7 : f32 to vector<64x128xf32>
    %15 = arith.select %11, %13, %14 : vector<64x128xi1>, vector<64x128xf32>
    %16 = arith.select %9, %0, %15 : vector<64x128xi1>, vector<64x128xf32>
    %cst_8 = arith.constant 1.000000e-10 : f32
    %17 = vector.broadcast %cst_8 : f32 to vector<64x128xf32>
    %18 = arith.cmpf olt, %16, %17 : vector<64x128xf32>
    %cst_9 = arith.constant 1.000000e-10 : f32
    %19 = vector.broadcast %cst_9 : f32 to vector<64x128xf32>
    %20 = arith.addf %16, %19 : vector<64x128xf32>
    %21 = arith.select %18, %20, %16 : vector<64x128xi1>, vector<64x128xf32>
    %cst_10 = arith.constant 1.000000e+00 : f32
    %22 = vector.broadcast %cst_10 : f32 to vector<64x128xf32>
    %23 = arith.subf %22, %21 : vector<64x128xf32>
    %24 = arith.mulf %23, %23 : vector<64x128xf32>
    %25 = math.log %21 : vector<64x128xf32>
    %26 = arith.mulf %24, %25 : vector<64x128xf32>
    %cst_11 = arith.constant dense<0.000000e+00> : vector<128xf32>
    %27 = vector.multi_reduction <add>, %26, %cst_11 [0] : vector<64x128xf32> to vector<128xf32>
    %28 = vector.shape_cast %27 : vector<128xf32> to vector<1x128xf32>
    %29 = tpu.concatenate %4, %7, %28 in 0 : vector<1x128xf32>, vector<1x128xf32>, vector<1x128xf32> -> vector<3x128xf32>
    %c0_i32 = arith.constant 0 : i32
    %30 = arith.cmpi eq, %arg1, %c0_i32 : i32
    %31 = arith.extui %30 : i1 to i32
    %c0_i32_12 = arith.constant 0 : i32
    %32 = arith.cmpi ne, %31, %c0_i32_12 : i32
    scf.if %32 {
      %cst_19 = arith.constant 0.000000e+00 : f32
      %39 = vector.broadcast %cst_19 : f32 to vector<3x128xf32>
      %c0_20 = arith.constant 0 : index
      %c0_21 = arith.constant 0 : index
      %c0_22 = arith.constant 0 : index
      %40 = vector.load %arg4[%c0_20, %c0_21, %c0_22] : memref<1x3x128xf32, #tpu.memory_space<vmem>>, vector<1x3x128xf32>
      %41 = vector.shape_cast %40 : vector<1x3x128xf32> to vector<3x128xf32>
      %42 = vector.shape_cast %39 : vector<3x128xf32> to vector<1x3x128xf32>
      tpu.vector_store %arg4[%c0_20, %c0_21, %c0_22], %42 {strides = array<i32>} : memref<1x3x128xf32, #tpu.memory_space<vmem>>, vector<1x3x128xf32>,
    } else {
    }
    %c0_13 = arith.constant 0 : index
    %c0_14 = arith.constant 0 : index
    %c0_15 = arith.constant 0 : index
    %33 = vector.load %arg4[%c0_13, %c0_14, %c0_15] : memref<1x3x128xf32, #tpu.memory_space<vmem>>, vector<1x3x128xf32>
    %34 = vector.shape_cast %33 : vector<1x3x128xf32> to vector<3x128xf32>
    %35 = arith.addf %34, %29 : vector<3x128xf32>
    %c0_16 = arith.constant 0 : index
    %c0_17 = arith.constant 0 : index
    %c0_18 = arith.constant 0 : index
    %36 = vector.load %arg4[%c0_16, %c0_17, %c0_18] : memref<1x3x128xf32, #tpu.memory_space<vmem>>, vector<1x3x128xf32>
    %37 = vector.shape_cast %36 : vector<1x3x128xf32> to vector<3x128xf32>
    %38 = vector.shape_cast %35 : vector<3x128xf32> to vector<1x3x128xf32>
    tpu.vector_store %arg4[%c0_16, %c0_17, %c0_18], %38 {strides = array<i32>} : memref<1x3x128xf32, #tpu.memory_space<vmem>>, vector<1x3x128xf32>,
    return
  }
  func.func @transform_0(%arg0: i32, %arg1: i32) -> (i32, i32) {
    %c1_i32 = arith.constant 1 : i32
    %0 = arith.muli %arg0, %c1_i32 : i32
    %1 = arith.addi %0, %arg1 : i32
    %c0_i32 = arith.constant 0 : i32
    %c0_i32_0 = arith.constant 0 : i32
    return %1, %c0_i32 : i32, i32
  }
  func.func @transform_1(%arg0: i32, %arg1: i32) -> (i32, i32) {
    %c1_i32 = arith.constant 1 : i32
    %0 = arith.muli %arg0, %c1_i32 : i32
    %1 = arith.addi %0, %arg1 : i32
    %c0_i32 = arith.constant 0 : i32
    %c0_i32_0 = arith.constant 0 : i32
    return %1, %c0_i32 : i32, i32
  }
  func.func @transform_2(%arg0: i32, %arg1: i32) -> (i32, i32, i32) {
    %c0_i32 = arith.constant 0 : i32
    %c0_i32_0 = arith.constant 0 : i32
    %c0_i32_1 = arith.constant 0 : i32
    return %arg0, %c0_i32, %c0_i32_0 : i32, i32, i32
  }
}

</mosaic_0001>

<bundles_post_ra>
// kernel: tpu_custom_call.1
= control target key start
LH: loop header
LB: loop body
LE: loop exit
PB: predicated region body
PF: predicated region fallthrough
CT: control target
= control target key end

     0   :  { %7 = vsyncpa [#allocation3], 0  ;;  %s1003_s0 = inlined_call_operand.hbm [shape: f32[128,128], index: 0, kind: input, shape index: {}]   ;;  %s1004_s1 = inlined_call_operand.hbm [shape: f32[128,128], index: 1, kind: input, shape index: {}]   ;;  %s1005_s2 = inlined_call_operand.vmem [shape: f32[2,3,128], index: 2, kind: output, shape index: {}]  }
   0x1   :  { %9 = vsyncpa [#allocation3 + $0x1], 0 }
   0x2   :  { %10 = vsyncpa [#allocation5], 0 }
   0x3   :  { %12 = vsyncpa [#allocation5 + $0x1], 0  ;;  %s742_s9 = smov 0   ;;  %s744_s10 = smov 0  }
   0x4   :  { %s746_s11 = smov 0   ;;  %s748_s12 = smov 0  }
   0x5   :  { %s750_s13 = smov 0   ;;  %s752_s14 = smov 0  }
   0x6 LB: > { %s509_s15 = sadd.s32 4294967295, %s720_s14   ;;  %s30_s16 = sadd.s32 1, %s716_s13  ;;  %s720_s14 = sphi %s752_s14, %s18_s14   ;;  %s716_s13 = sphi %s750_s13, %s1016_s13   ;;  %s712_s12 = sphi %s748_s12, %s1015_s12   ;;  %s708_s11 = sphi %s746_s11, %s1014_s11   ;;  %s704_s10 = sphi %s744_s10, %s1013_s10   ;;  %s700_s9 = sphi %s742_s9, %s1012_s9  }
   0x7   : > { %p32_p0 = scmp.ge.s32.totalorder %s30_s16, 2  ;;  %s39_s17 = sadd.s32 1, %s708_s11 }
   0x8   : > { %p46_p1 = scmp.ne.s32.totalorder %s708_s11, %s704_s10  ;;  %p47_p2 = scmp.eq.s32.totalorder %s720_s14, 0 }
   0x9   : > { %s1018_s16 = smov (%p32_p0, %s30_s16), 0  ;;  %p52_p4 = scmp.ne.s32.totalorder %s704_s10, %s700_s9 }
   0xa   : > { %p778_p3 = por %p47_p2, %p46_p1  ;;  %s36_s19 = ssub.s32 %s716_s13, %s1018_s16 }
   0xb   : > { %p53_p5 = scmp.eq.s32.totalorder %s509_s15, 0  ;;  %p37_p6 = scmp.eq.s32.totalorder %s36_s19, 0 }
   0xc   : > { %p538_p8 = scmp.lt.s32.totalorder %s720_s14, 2  ;;  %s794_s22 = sand.u32 1, %s708_s11  }
   0xd   : > { %p785_p7 = por %p53_p5, %p52_p4  ;;  %s525_s23 = sshll.u32 %s716_s13, 10 }
   0xe   : > { %s791_s21 = scalar_select %p37_p6, %s708_s11, %s39_s17  }
   0xf   : > { %s1008_s20 = scalar_select %p785_p7, 1, 0 }
  0x10   : > { %s513_s24 = sshll.u32 %s794_s22, 6  ;;  %s803_s27 = scalar_lea.hbm %s1003_s0, %s525_s23 }
  0x11   : > { %s134_s28 = scalar_lea.vmem [#allocation2], %s513_s24  ;;  %p809_p9 = pnand %p538_p8, %p778_p3 }
  0x12   : > { %s142_s29 = sshll.u32 %s134_s28, 4  ;;  %s131_s3 = scalar_lea.sflag [#allocation3], %s794_s22  ;;  %s813_s29 = int_to_ptr.vmem [resolvable:$true] %s142_s29 }
  0x13   : > { %s606_s4 = scalar_lea.hbm %s803_s27, 1024  ;;  %p608_p11 = pneg %p809_p9 }
  0x14   : > { %p607_p10 = scmp.ne.s32.totalorder %s803_s27, %s606_s4  ;;  %s611_s7 = scalar_lea.hbm %s1003_s0, 2048 }
  0x15   : > { %p612_p0 = scmp.lt.u32.totalorder %s803_s27, %s1003_s0  ;;  %p613_p1 = scmp.lt.u32.totalorder %s611_s7, %s606_s4 }
  0x16   : > { %p609_p12 = pnand %p608_p11, %p607_p10  ;;  %p615_p3 = scmp.lt.u32.totalorder %s606_s4, %s803_s27 }
  0x17   : > { %p614_p2 = por %p613_p1, %p612_p0 }
  0x18   : > { %p610_p13 = pneg %p609_p12 }
  0x19   : > { %p616_p4 = por %p615_p3, %p614_p2 }
  0x1b   : > { %p617_p5 = pnand %p616_p4, %p610_p13 }
  0x1d   : > { %620 = shalt.err (!%p617_p5)
}
  0x1e   : > { %s621_s15 = scalar_lea.vmem %s813_s29, 1024  ;;  %s722_s17 = smov [#allocation2]  }
  0x1f   : > { %p622_p6 = scmp.ne.s32.totalorder %s813_s29, %s621_s15  ;;  %s626_s18 = sshll.u32 %s722_s17, 4  ;;  %s627_s18 = int_to_ptr.vmem [resolvable:$false] %s626_s18 }
  0x20   : > { %s628_s19 = scalar_lea.vmem %s627_s18, 2048  ;;  %p629_p12 = scmp.lt.s32.totalorder %s813_s29, %s627_s18 }
  0x21   : > { %p624_p8 = pnand %p622_p6, %p608_p11  ;;  %p630_p0 = scmp.lt.s32.totalorder %s628_s19, %s621_s15 }
  0x23   : > { %p625_p10 = pneg %p624_p8  ;;  %p631_p1 = por %p630_p0, %p629_p12 }
  0x25   : > { %p632_p2 = pnand %p631_p1, %p625_p10 }
  0x27   : > { %635 = shalt.err (!%p632_p2)
}
  0x28   : > { %s723_s25 = smov 128   ;;  %s724_s26 = smov 8  }
  0x29   : > { %534 = dma.hbm_to_vmem [thread:$0]  (!%p809_p9), %s803_s27, 1024, %s813_s29, %s131_s3, %s723_s25, %s723_s25, %s724_s26  }
  0x2a   : > { %p519_p13 = scmp.ge.s32.totalorder %s720_s14, 1  ;;  %p172_p3 = scmp.lt.s32.totalorder %s720_s14, 3 }
  0x2b   : > { %s857_s6 = scalar_lea.hbm %s1004_s1, %s525_s23  ;;  %s156_s7 = scalar_lea.vmem [#allocation4], %s513_s24 }
  0x2c   : > { %p848_p4 = pnand %p519_p13, %p172_p3  ;;  %s164_s8 = sshll.u32 %s156_s7, 4  ;;  %s861_s8 = int_to_ptr.vmem [resolvable:$true] %s164_s8 }
  0x2d   : > { %s153_s27 = scalar_lea.sflag [#allocation5], %s794_s22  ;;  %s636_s29 = scalar_lea.hbm %s857_s6, 1024 }
  0x2e   : > { %p637_p5 = scmp.ne.s32.totalorder %s857_s6, %s636_s29  ;;  %s641_s23 = scalar_lea.hbm %s1004_s1, 2048 }
  0x2f   : > { %p642_p10 = scmp.lt.u32.totalorder %s857_s6, %s1004_s1  ;;  %p643_p12 = scmp.lt.u32.totalorder %s641_s23, %s636_s29 }
  0x30   : > { %p639_p6 = pnand %p637_p5, %p608_p11  ;;  %p645_p1 = scmp.lt.u32.totalorder %s636_s29, %s857_s6 }
  0x31   : > { %p644_p0 = por %p643_p12, %p642_p10 }
  0x32   : > { %p640_p8 = pneg %p639_p6 }
  0x33   : > { %p646_p2 = por %p645_p1, %p644_p0 }
  0x35   : > { %p647_p13 = pnand %p646_p2, %p640_p8 }
  0x37   : > { %650 = shalt.err (!%p647_p13)
}
  0x38   : > { %s651_s24 = scalar_lea.vmem %s861_s8, 1024  ;;  %s725_s18 = smov [#allocation4]  }
  0x39   : > { %p652_p3 = scmp.ne.s32.totalorder %s861_s8, %s651_s24  ;;  %s656_s19 = sshll.u32 %s725_s18, 4  ;;  %s657_s19 = int_to_ptr.vmem [resolvable:$false] %s656_s19 }
  0x3a   : > { %s658_s4 = scalar_lea.vmem %s657_s19, 2048  ;;  %p659_p7 = scmp.lt.s32.totalorder %s861_s8, %s657_s19 }
  0x3b   : > { %p654_p5 = pnand %p652_p3, %p608_p11  ;;  %p660_p10 = scmp.lt.s32.totalorder %s658_s4, %s651_s24 }
  0x3d   : > { %p655_p6 = pneg %p654_p5  ;;  %p661_p12 = por %p660_p10, %p659_p7 }
  0x3f   : > { %p662_p0 = pnand %p661_p12, %p655_p6 }
  0x41   : > { %665 = shalt.err (!%p662_p0)
}
  0x42   : > { %537 = dma.hbm_to_vmem [thread:$0]  (!%p809_p9), %s857_s6, 1024, %s861_s8, %s153_s27, %s723_s25, %s723_s25, %s724_s26  }
  0x43   : > { %176 = sbr.rel (%p848_p4) target bundleno = 144 (0x90), region = 28  ;;  %s178_s5 = sand.u32 (!%p848_p4), 1, %s704_s10  }
  0x44   : > { %s520_s7 = sshll.u32 (!%p848_p4), %s178_s5, 6  ;;  %s179_s29 = scalar_lea.sflag (!%p848_p4), [#allocation3], %s178_s5 }
  0x45   : > { %s895_s3 = scalar_lea.vmem (!%p848_p4), [#allocation2], %s520_s7  ;;  %p1011_p7 = scmp.ne.s32.totalorder (!%p848_p4), %s1008_s20, 0 }
  0x4a   : > { %691 = dma.done.wait (%p1011_p7), %s179_s29, 1024  }
  0x4b   : > { %693 = vsyncadd (%p1011_p7), %s179_s29, 4294966272  ;;  %s188_s22 = scalar_lea.sflag [#allocation5], %s178_s5  ;;  %s901_s30 = scalar_lea.vmem [#allocation4], %s520_s7 }
  0x4c   : > { %695 = dma.done.wait (%p1011_p7), %s188_s22, 1024  }
  0x4d   : > { %697 = vsyncadd (%p1011_p7), %s188_s22, 4294966272  ;;  %p220_p9 = scmp.lt.s32.totalorder %s712_s12, 1  ;;  %v726_v0 = vmov 0.0   ;;  %v224_v1 = vld [vmem:[%s895_s3] sm:$0xff]  ;;  %v225_v2 = vld [vmem:[%s895_s3 + $0x8] sm:$0xff] }
  0x4e   : > { %v232_v3 = vld [vmem:[%s901_s30] sm:$0xff]  ;;  %v233_v4 = vld [vmem:[%s901_s30 + $0x8] sm:$0xff]  ;;  %v226_v7 = vld [vmem:[%s895_s3 + $0x10] sm:$0xff]  ;;  %v298_v14 = vsub.f32 1.0, %v224_v1  ;;  %v299_v17 = vsub.f32 1.0, %v225_v2 }
  0x4f   : > { %s1020_s12 = smov (!%p220_p9, %s712_s12), 1  ;;  %v240_v5 = vmul.f32 %v232_v3, %v224_v1  ;;  %v241_v6 = vmul.f32 %v233_v4, %v225_v2  ;;  %v227_v8 = vld [vmem:[%s895_s3 + $0x18] sm:$0xff]  ;;  %v922_v9 = vld [vmem:[%s895_s3 + $0x20] sm:$0xff]  ;;  %v925_v10 = vld [vmem:[%s895_s3 + $0x28] sm:$0xff]  ;;  %v261_v11 = vadd.f32 %v232_v3, %v224_v1  ;;  %v262_v12 = vadd.f32 %v233_v4, %v225_v2 }
  0x50   : > { %s522_s25 = sshll.u32 %s1020_s12, 2  ;;  %v234_v13 = vld [vmem:[%s901_s30 + $0x10] sm:$0xff]  ;;  %v300_v18 = vsub.f32 1.0, %v226_v7  ;;  %v235_v20 = vld [vmem:[%s901_s30 + $0x18] sm:$0xff]  ;;  %vm282_vm0 = vcmp.eq.f32.partialorder %v232_v3, 1.0  ;;  %v301_v21 = vsub.f32 1.0, %v227_v8 }
  0x51   : > { %s912_s6 = scalar_lea.vmem %s1005_s2, %s522_s25  ;;  %v242_v15 = vmul.f32 %v234_v13, %v226_v7  ;;  %v248_v16 = vadd.f32 %v241_v6, %v240_v5  ;;  %v929_v19 = vld [vmem:[%s895_s3 + $0x30] sm:$0xff]  ;;  %v302_v22 = vsub.f32 1.0, %v922_v9  ;;  %v303_v23 = vsub.f32 1.0, %v925_v10  ;;  %v236_v24 = vld [vmem:[%s901_s30 + $0x20] sm:$0xff]  ;;  %v237_v25 = vld [vmem:[%s901_s30 + $0x28] sm:$0xff] }
  0x52   : > { %407 = vst [vmem:[%s912_s6] sm:$0x7] %v726_v0  ;;  %v937_v26 = vld [vmem:[%s901_s30 + $0x30] sm:$0xff]  ;;  %v243_v27 = vmul.f32 %v235_v20, %v227_v8  ;;  %v263_v28 = vadd.f32 %v234_v13, %v226_v7  ;;  %v269_v29 = vadd.f32 %v262_v12, %v261_v11  ;;  %vm290_vm1 = vcmp.eq.f32.partialorder %v232_v3, 0.0  ;;  %v949_v36 = vld [vmem:[%s895_s3 + $0x38] sm:$0xff] }
  0x53   : > { %v244_v30 = vmul.f32 %v236_v24, %v922_v9  ;;  %v941_v31 = vmul.f32 %v237_v25, %v925_v10  ;;  %v945_v32 = vmul.f32 %v937_v26, %v929_v19  ;;  %vm291_vm2 = vcmp.eq.f32.partialorder %v233_v4, 0.0  ;;  %v952_v38 = vld [vmem:[%s901_s30 + $0x38] sm:$0xff] }
  0x54   : > { %v249_v33 = vadd.f32 %v248_v16, %v242_v15  ;;  %v264_v34 = vadd.f32 %v235_v20, %v227_v8  ;;  %v265_v35 = vadd.f32 %v236_v24, %v922_v9  ;;  %vm292_vm3 = vcmp.eq.f32.partialorder %v234_v13, 0.0 }
  0x55   : > { %vm283_vm4 = vcmp.eq.f32.partialorder %v233_v4, 1.0  ;;  %vm284_vm5 = vcmp.eq.f32.partialorder %v234_v13, 1.0  ;;  %vm293_vm6 = vcmp.eq.f32.partialorder %v235_v20, 0.0  ;;  %v306_v37 = vsel %vm290_vm1, %v298_v14, 0.0 }
  0x56   : > { %v270_v39 = vadd.f32 %v269_v29, %v263_v28  ;;  %vm285_vm7 = vcmp.eq.f32.partialorder %v235_v20, 1.0  ;;  %vm294_vm8 = vcmp.eq.f32.partialorder %v236_v24, 0.0  ;;  %v307_v40 = vsel %vm291_vm2, %v299_v17, 0.0 }
  0x57   : > { %vm286_vm9 = vcmp.eq.f32.partialorder %v236_v24, 1.0  ;;  %vm295_vm10 = vcmp.eq.f32.partialorder %v237_v25, 0.0  ;;  %v304_v41 = vsub.f32 1.0, %v929_v19  ;;  %v308_v42 = vsel %vm292_vm3, %v300_v18, 0.0 }
  0x58   : > { %vm296_vm11 = vcmp.eq.f32.partialorder %v937_v26, 0.0  ;;  %v305_v43 = vsub.f32 1.0, %v949_v36  ;;  %v309_v44 = vsel %vm293_vm6, %v301_v21, 0.0  ;;  %v314_v45 = vsel %vm282_vm0, %v224_v1, %v306_v37 }
  0x59   : > { %vm287_vm12 = vcmp.eq.f32.partialorder %v237_v25, 1.0  ;;  %vm297_vm13 = vcmp.eq.f32.partialorder %v952_v38, 0.0  ;;  %v310_v46 = vsel %vm294_vm8, %v302_v22, 0.0  ;;  %v315_v47 = vsel %vm283_vm4, %v225_v2, %v307_v40 }
  0x5a   : > { %v250_v48 = vadd.f32 %v249_v33, %v243_v27  ;;  %vm288_vm14 = vcmp.eq.f32.partialorder %v937_v26, 1.0  ;;  %v311_v49 = vsel %vm295_vm10, %v303_v23, 0.0  ;;  %v316_v50 = vsel %vm284_vm5, %v226_v7, %v308_v42 }
  0x5b   : > { %vm289_vm15 = vcmp.eq.f32.partialorder %v952_v38, 1.0  ;;  %v312_v51 = vsel %vm296_vm11, %v304_v41, 0.0  ;;  %v317_v52 = vsel %vm285_vm7, %v227_v8, %v309_v44  ;;  %v330_v53 = vadd.f32 1e-10, %v314_v45 }
  0x5c   : > { %v313_v54 = vsel %vm297_vm13, %v305_v43, 0.0  ;;  %v318_v55 = vsel %vm286_vm9, %v922_v9, %v310_v46  ;;  %vm322_vm0 = vcmp.lt.f32.partialorder %v314_v45, 1e-10  ;;  %v331_v56 = vadd.f32 1e-10, %v315_v47 }
  0x5d   : > { %v271_v57 = vadd.f32 %v270_v39, %v264_v34  ;;  %v319_v58 = vsel %vm287_vm12, %v925_v10, %v311_v49  ;;  %vm323_vm1 = vcmp.lt.f32.partialorder %v315_v47, 1e-10  ;;  %v332_v59 = vadd.f32 1e-10, %v316_v50 }
  0x5e   : > { %v251_v60 = vadd.f32 %v250_v48, %v244_v30  ;;  %v320_v61 = vsel %vm288_vm14, %v929_v19, %v312_v51  ;;  %vm324_vm2 = vcmp.lt.f32.partialorder %v316_v50, 1e-10  ;;  %v333_v62 = vadd.f32 1e-10, %v317_v52 }
  0x5f   : > { %v321_v63 = vsel %vm289_vm15, %v949_v36, %v313_v54  ;;  %vm325_vm3 = vcmp.lt.f32.partialorder %v317_v52, 1e-10  ;;  %v334_v0 = vadd.f32 1e-10, %v318_v55  ;;  %v338_v1 = vsel %vm322_vm0, %v330_v53, %v314_v45 }
  0x60   : > { %v266_v2 = vadd.f32 %v237_v25, %v925_v10  ;;  %vm326_vm4 = vcmp.lt.f32.partialorder %v318_v55, 1e-10  ;;  %v335_v3 = vadd.f32 1e-10, %v319_v58  ;;  %v339_v4 = vsel %vm323_vm1, %v331_v56, %v315_v47 }
  0x61   : > { %v272_v5 = vadd.f32 %v271_v57, %v265_v35  ;;  %vm327_vm5 = vcmp.lt.f32.partialorder %v319_v58, 1e-10  ;;  %v336_v6 = vadd.f32 1e-10, %v320_v61  ;;  %v340_v7 = vsel %vm324_vm2, %v332_v59, %v316_v50 }
  0x62   : > { %vm328_vm6 = vcmp.lt.f32.partialorder %v320_v61, 1e-10  ;;  %v337_v8 = vadd.f32 1e-10, %v321_v63  ;;  %v341_v9 = vsel %vm325_vm3, %v333_v62, %v317_v52  ;;  %590 = vlog2.f32 %v338_v1 }
  0x63   : > { %v252_v11 = vadd.f32 %v251_v60, %v941_v31  ;;  %vm329_vm7 = vcmp.lt.f32.partialorder %v321_v63, 1e-10  ;;  %v342_v12 = vsel %vm326_vm4, %v334_v0, %v318_v55  ;;  %592 = vlog2.f32 %v339_v4 }
  0x64   : > { %v343_v13 = vsel %vm327_vm5, %v335_v3, %v319_v58  ;;  %594 = vlog2.f32 %v340_v7  ;;  %v267_v10 = vadd.f32 %v937_v26, %v929_v19  ;;  %v273_v14 = vadd.f32 %v272_v5, %v266_v2 }
  0x65   : > { %v344_v15 = vsel %vm328_vm6, %v336_v6, %v320_v61  ;;  %596 = vlog2.f32 %v341_v9  ;;  %v345_v16 = vsel %vm329_vm7, %v337_v8, %v321_v63  ;;  %v247_v17 = vmul.f32 %v952_v38, %v949_v36 }
  0x66   : > { %598 = vlog2.f32 %v342_v12  ;;  %v253_v18 = vadd.f32 %v252_v11, %v945_v32  ;;  %v346_v20 = vsub.f32 1.0, %v338_v1  ;;  %v347_v21 = vsub.f32 1.0, %v339_v4 }
  0x67   : > { %600 = vlog2.f32 %v343_v13  ;;  %v268_v22 = vadd.f32 %v952_v38, %v949_v36  ;;  %v274_v23 = vadd.f32 %v273_v14, %v267_v10  ;;  %v348_v24 = vsub.f32 1.0, %v340_v7 }
  0x68   : > { %602 = vlog2.f32 %v344_v15  ;;  %v349_v19 = vsub.f32 1.0, %v341_v9  ;;  %v254_v25 = vadd.f32 %v253_v18, %v247_v17  ;;  %v354_v26 = vmul.f32 %v346_v20, %v346_v20 }
  0x69   : > { %604 = vlog2.f32 %v345_v16  ;;  %v350_v28 = vsub.f32 1.0, %v342_v12  ;;  %v355_v29 = vmul.f32 %v347_v21, %v347_v21  ;;  %v275_v31 = vadd.f32 %v274_v23, %v268_v22 }
  0x6a   : > { %v356_v33 = vmul.f32 %v348_v24, %v348_v24  ;;  %v351_v35 = vsub.f32 1.0, %v343_v13  ;;  %v357_v37 = vmul.f32 %v349_v19, %v349_v19  ;;  %v255_v41 = vrot.slane %v254_v25, 4 }
  0x6b   : > { %v352_v43 = vsub.f32 1.0, %v344_v15  ;;  %v358_v44 = vmul.f32 %v350_v28, %v350_v28  ;;  %v276_v48 = vrot.slane %v275_v31, 4  ;;  %v353_v49 = vsub.f32 1.0, %v345_v16 }
  0x6c   : > { %v591_v27 = vpop.eup %590  ;;  %v359_v53 = vmul.f32 %v351_v35, %v351_v35  ;;  %v256_v62 = vadd.f32 %v255_v41, %v254_v25  ;;  %vm399_vm8 = vcmask 1040384   ;;  %vm401_vm9 = vcmask 1041408   ;;  %v408_v25 = vld [vmem:[%s912_s6] sm:$0x7] }
  0x6d   : > { %v593_v30 = vpop.eup %592  ;;  %v363_v32 = vmul.f32 0.6931472, %v591_v27  ;;  %v360_v58 = vmul.f32 %v352_v43, %v352_v43  ;;  %v277_v63 = vadd.f32 %v276_v48, %v275_v31  ;;  %v361_v0 = vmul.f32 %v353_v49, %v353_v49 }
  0x6e   : > { %v595_v34 = vpop.eup %594  ;;  %v365_v39 = vmul.f32 0.6931472, %v593_v30  ;;  %v257_v6 = vrot.slane %v256_v62, 2 }
  0x6f   : > { %v597_v40 = vpop.eup %596  ;;  %v367_v36 = vmul.f32 0.6931472, %v595_v34  ;;  %v378_v38 = vmul.f32 %v363_v32, %v354_v26  ;;  %v278_v7 = vrot.slane %v277_v63, 2 }
  0x70   : > { %v599_v42 = vpop.eup %598  ;;  %v369_v45 = vmul.f32 0.6931472, %v597_v40  ;;  %v379_v46 = vmul.f32 %v365_v39, %v355_v29  ;;  %v258_v12 = vadd.f32 %v257_v6, %v256_v62 }
  0x71   : > { %v601_v47 = vpop.eup %600  ;;  %v371_v50 = vmul.f32 0.6931472, %v599_v42  ;;  %v380_v51 = vmul.f32 %v367_v36, %v356_v33  ;;  %v279_v13 = vadd.f32 %v278_v7, %v277_v63 }
  0x72   : > { %v603_v52 = vpop.eup %602  ;;  %v373_v54 = vmul.f32 0.6931472, %v601_v47  ;;  %v381_v55 = vmul.f32 %v369_v45, %v357_v37  ;;  %v386_v56 = vadd.f32 %v379_v46, %v378_v38  ;;  %v259_v15 = vrot.slane %v258_v12, 1 }
  0x73   : > { %v605_v57 = vpop.eup %604  ;;  %v375_v59 = vmul.f32 0.6931472, %v603_v52  ;;  %v382_v60 = vmul.f32 %v371_v50, %v358_v44  ;;  %v280_v16 = vrot.slane %v279_v13, 1 }
  0x74   : > { %v387_v61 = vadd.f32 %v386_v56, %v380_v51  ;;  %v377_v1 = vmul.f32 0.6931472, %v605_v57  ;;  %v383_v2 = vmul.f32 %v373_v54, %v359_v53  ;;  %v260_v20 = vadd.f32 %v259_v15, %v258_v12 }
  0x75   : > { %v384_v4 = vmul.f32 %v375_v59, %v360_v58  ;;  %v281_v21 = vadd.f32 %v280_v16, %v279_v13 }
  0x76   : > { %v388_v3 = vadd.f32 %v387_v61, %v381_v55  ;;  %v385_v8 = vmul.f32 %v377_v1, %v361_v0 }
  0x77   : > { %v400_v24 = vsel %vm399_vm8, %v260_v20, %v281_v21 }
  0x78   : > { %v389_v5 = vadd.f32 %v388_v3, %v382_v60 }
  0x7a   : > { %v390_v9 = vadd.f32 %v389_v5, %v383_v2 }
  0x7c   : > { %v391_v11 = vadd.f32 %v390_v9, %v384_v4 }
  0x7e   : > { %v392_v10 = vadd.f32 %v391_v11, %v385_v8 }
  0x80   : > { %v393_v14 = vrot.slane %v392_v10, 4 }
  0x82   : > { %v394_v17 = vadd.f32 %v393_v14, %v392_v10 }
  0x84   : > { %v395_v18 = vrot.slane %v394_v17, 2 }
  0x86   : > { %v396_v22 = vadd.f32 %v395_v18, %v394_v17 }
  0x88   : > { %v397_v23 = vrot.slane %v396_v22, 1 }
  0x8a   : > { %v398_v19 = vadd.f32 %v397_v23, %v396_v22 }
  0x8c   : > { %v402_v26 = vsel %vm401_vm9, %v400_v24, %v398_v19 }
  0x8d   : > { %v409_v27 = vadd.f32 %v408_v25, %v402_v26 }
  0x8f   : > { %410 = vst [vmem:[%s912_s6] sm:$0x7] %v409_v27 }
  0x90 PF: > { %s18_s14 = sadd.s32 1, %s720_s14   ;;  %s1012_s9 = smov %s704_s10 }
  0x91   : > { %p15_p11 = scmp.ge.s32.totalorder %s18_s14, 4   ;;  %s1013_s10 = smov %s708_s11 }
  0x92   : > { %s1014_s11 = smov %s791_s21  ;;  %s1015_s12 = smov %s716_s13 }
  0x93   : > { %s1016_s13 = smov %s1018_s16  ;;  %17 = sbr.rel (!%p15_p11) target bundleno = 6 (0x6), region = 85 }
  0x9a   :  { %430 = vsyncpa [#allocation3], 1 }
  0x9b   :  { %432 = vsyncpa [#allocation3 + $0x1], 1 }
  0x9c   :  { %433 = vsyncpa [#allocation5], 1 }
  0x9d   :  { %435 = vsyncpa [#allocation5 + $0x1], 1 }

</bundles_post_ra>
